<compile_context>
chip_gen: v6e
topology: v6e:2x2x1
jax: 0.10.0
libtpu: 0.0.40
codegen_flags: <defaults>
</compile_context>

<pallas_src>
import jax
import jax.numpy as jnp
from jax.experimental import pallas as pl
from jax.experimental.pallas import tpu as pltpu


def _round_up(x: int, m: int) -> int:
    return ((x + m - 1) // m) * m


def _decoder_kernel(z_ref, w1_ref, b1_ref, w2_ref, b2_ref, out_ref):
    # linear1 + relu: MXU matmul with f32 accumulation, bias add / relu on VPU.
    h = jnp.dot(z_ref[...], w1_ref[...], preferred_element_type=jnp.float32)
    h = jnp.maximum(h + b1_ref[...], 0.0)          # b1 is (1, Hp) -> broadcast
    # linear2 + sigmoid: second MXU matmul; sigmoid uses the EUP.
    o = jnp.dot(h.astype(w2_ref.dtype), w2_ref[...],
                preferred_element_type=jnp.float32)
    o = o + b2_ref[...]                            # b2 is (1, O) -> broadcast
    out_ref[...] = jax.nn.sigmoid(o).astype(out_ref.dtype)


def prepare_decoder_params(w1, b1, w2, b2, dtype=None):
    """Pad the hidden dim to a multiple of 128 ONCE (exact zero padding) and
    reshape biases to (1, dim).  Weights are (in_features, out_features).
    `dtype` optionally casts stored weights (e.g. jnp.bfloat16 to halve
    weight HBM bytes and double MXU rate)."""
    L, H = w1.shape
    H2, O = w2.shape
    assert H2 == H, "w1/w2 hidden dims must match"
    if dtype is None:
        dtype = w1.dtype
    Hp = _round_up(H, 128)
    w1p = jnp.zeros((L, Hp), dtype).at[:, :H].set(w1.astype(dtype))
    b1p = jnp.zeros((1, Hp), dtype).at[0, :H].set(b1.astype(dtype))
    w2p = jnp.zeros((Hp, O), dtype).at[:H, :].set(w2.astype(dtype))
    b2p = b2.astype(dtype).reshape(1, O)
    return w1p, b1p, w2p, b2p


def decoder_forward(z, params):
    """z: (B, latent); params from prepare_decoder_params -> (B, output)."""
    w1p, b1p, w2p, b2p = params
    B, L = z.shape
    Lw, Hp = w1p.shape
    Hp2, O = w2p.shape
    assert Lw == L and Hp2 == Hp, "params do not match z / each other"
    dtype = z.dtype

    z_isz = jnp.dtype(dtype).itemsize
    w_isz = jnp.dtype(w1p.dtype).itemsize

    # --- VMEM accounting -----------------------------------------------------
    # Resident weights/biases (single-buffered when Buffered(1) is honored;
    # budget conservatively assumes 2x in case of fallback).
    weight_bytes = (L * Hp + Hp + Hp * O + O) * w_isz
    # Per batch-row bytes: z & out tiles double-buffered by the pipeline,
    # plus the f32 `h` and `o` intermediates.
    per_row = 2 * L * z_isz + 2 * O * z_isz + Hp * 4 + O * 4

    try:
        vmem_cap = int(pltpu.get_tpu_info().vmem_capacity_bytes)
    except Exception:
        vmem_cap = 64 << 20                       # conservative (v7x per-TC)
    hard_cap = vmem_cap * 7 // 8                  # stay below physical VMEM
    budget = hard_cap - 2 * weight_bytes - (4 << 20)

    # --- batch tiling ---------------------------------------------------------
    sub = 8 if z_isz >= 4 else (16 if z_isz == 2 else 32)   # sublane packing
    tile_max = min(2048, max(sub, (budget // max(per_row, 1)) // sub * sub))

    Bs = _round_up(B, sub)
    if Bs <= tile_max:
        # Single pass fits VMEM; for moderate B split into 2 tiles so a 2-TC
        # chip (v7x megacore) has >= 2 grid steps to shard.
        tile_b = _round_up(-(-Bs // 2), sub) if Bs > 256 else Bs
    else:
        n = -(-Bs // tile_max)
        tile_b = _round_up(-(-Bs // n), sub)       # keeps Bp - B small
    num_tiles = -(-Bs // tile_b)
    Bp = num_tiles * tile_b

    vmem_limit = min(hard_cap, 2 * weight_bytes + tile_b * per_row + (4 << 20))
    vmem_limit = int(max(vmem_limit, 16 << 20))

    # Only the (cheap) batch-row pad remains on the wrapper side.
    zp = z if Bp == B else jnp.pad(z, ((0, Bp - B), (0, 0)))

    def run(single_buffer_weights):
        wkw = {"pipeline_mode": pl.Buffered(1)} if single_buffer_weights else {}
        in_specs = [
            pl.BlockSpec((tile_b, L), lambda i: (i, 0)),          # z: batch-tiled
            pl.BlockSpec((L, Hp), lambda i: (0, 0), **wkw),       # w1: resident
            pl.BlockSpec((1, Hp), lambda i: (0, 0), **wkw),       # b1: resident
            pl.BlockSpec((Hp, O), lambda i: (0, 0), **wkw),       # w2: resident
            pl.BlockSpec((1, O), lambda i: (0, 0), **wkw),        # b2: resident
        ]
        return pl.pallas_call(
            _decoder_kernel,
            out_shape=jax.ShapeDtypeStruct((Bp, O), dtype),
            grid=(num_tiles,),
            in_specs=in_specs,
            out_specs=pl.BlockSpec((tile_b, O), lambda i: (i, 0)),
            compiler_params=pltpu.CompilerParams(
                dimension_semantics=("parallel",),
                vmem_limit_bytes=vmem_limit,
            ),
        )(zp, w1p, b1p, w2p, b2p)

    try:
        out = jax.block_until_ready(run(True))     # single-buffered weights
    except Exception:
        out = run(False)                           # fallback: default buffering

    return out if Bp == B else out[:B]


def init_params(key, latent_dim, hidden_dim, output_dim, dtype=jnp.float32):
    """Deterministic init mirroring nn.Linear's default U(-1/sqrt(fan_in), +1/sqrt(fan_in)).
       Weights are stored transposed, i.e. (in_features, out_features)."""
    k1, k2, k3, k4 = jax.random.split(key, 4)
    lim1 = 1.0 / jnp.sqrt(latent_dim)
    lim2 = 1.0 / jnp.sqrt(hidden_dim)
    w1 = jax.random.uniform(k1, (latent_dim, hidden_dim), dtype, -lim1, lim1)
    b1 = jax.random.uniform(k2, (hidden_dim,), dtype, -lim1, lim1)
    w2 = jax.random.uniform(k3, (hidden_dim, output_dim), dtype, -lim2, lim2)
    b2 = jax.random.uniform(k4, (output_dim,), dtype, -lim2, lim2)
    return w1, b1, w2, b2


if __name__ == "__main__":
    # Small shapes consistent with the module's forward: z is (batch, latent_dim)
    batch, latent_dim, hidden_dim, output_dim = 8, 16, 32, 64

    key = jax.random.PRNGKey(0)
    kz, kp = jax.random.split(key)
    z = jax.random.normal(kz, (batch, latent_dim), dtype=jnp.float32)
    w1, b1, w2, b2 = init_params(kp, latent_dim, hidden_dim, output_dim)

    # Pad/layout weights ONCE (not per forward call).
    params = prepare_decoder_params(w1, b1, w2, b2)

    x_hat = decoder_forward(z, params)
    x_hat = jax.block_until_ready(x_hat)

    # Sanity check against a pure-JAX reference of the same math.
    ref = jax.nn.sigmoid(jnp.maximum(z @ w1 + b1, 0.0) @ w2 + b2)
    assert x_hat.shape == (batch, output_dim)
    assert jnp.allclose(x_hat, ref, atol=1e-5), "mismatch vs reference"

    print("KERNEL_OK")
</pallas_src>

<mosaic_0001>
module attributes {stable_mosaic.version = 11 : i64} {
  func.func @_decoder_kernel(%arg0: i32, %arg1: memref<8x16xf32, #tpu.memory_space<vmem>>, %arg2: memref<16x128xf32, #tpu.memory_space<vmem>>, %arg3: memref<1x128xf32, #tpu.memory_space<vmem>>, %arg4: memref<128x64xf32, #tpu.memory_space<vmem>>, %arg5: memref<1x64xf32, #tpu.memory_space<vmem>>, %arg6: memref<8x64xf32, #tpu.memory_space<vmem>>) attributes {dimension_semantics = [#tpu.dimension_semantics<parallel>], iteration_bounds = array<i64: 1>, scalar_prefetch = 0 : i64, scratch_operands = 0 : i64, tpu.core_type = #tpu.core_type<tc>, window_params = [{transform_indices = @transform_0, window_bounds = array<i64: 8, 16>}, {pipeline_mode = #tpu.pipeline_mode<synchronous>, transform_indices = @transform_1, window_bounds = array<i64: 16, 128>}, {pipeline_mode = #tpu.pipeline_mode<synchronous>, transform_indices = @transform_2, window_bounds = array<i64: 1, 128>}, {pipeline_mode = #tpu.pipeline_mode<synchronous>, transform_indices = @transform_3, window_bounds = array<i64: 128, 64>}, {pipeline_mode = #tpu.pipeline_mode<synchronous>, transform_indices = @transform_4, window_bounds = array<i64: 1, 64>}, {transform_indices = @transform_5, window_bounds = array<i64: 8, 64>}]} {
    %c0 = arith.constant 0 : index
    %c0_0 = arith.constant 0 : index
    %0 = vector.load %arg1[%c0, %c0_0] : memref<8x16xf32, #tpu.memory_space<vmem>>, vector<8x16xf32>
    %c0_1 = arith.constant 0 : index
    %c0_2 = arith.constant 0 : index
    %1 = vector.load %arg2[%c0_1, %c0_2] : memref<16x128xf32, #tpu.memory_space<vmem>>, vector<16x128xf32>
    %cst = arith.constant dense<0.000000e+00> : vector<8x128xf32>
    %2 = tpu.matmul %0, %1, %cst {dimension_numbers = #tpu.dot_dimension_numbers<[1], [0], [0], [1], [0, 0, 1, 1], [], []>} : vector<8x16xf32>, vector<16x128xf32>, vector<8x128xf32> -> vector<8x128xf32>
    %c0_3 = arith.constant 0 : index
    %c0_4 = arith.constant 0 : index
    %3 = vector.load %arg3[%c0_3, %c0_4] : memref<1x128xf32, #tpu.memory_space<vmem>>, vector<1x128xf32>
    %4 = vector.broadcast %3 : vector<1x128xf32> to vector<8x128xf32>
    %5 = arith.addf %2, %4 : vector<8x128xf32>
    %cst_5 = arith.constant 0.000000e+00 : f32
    %6 = vector.broadcast %cst_5 : f32 to vector<8x128xf32>
    %7 = arith.maximumf %5, %6 : vector<8x128xf32>
    %c0_6 = arith.constant 0 : index
    %c0_7 = arith.constant 0 : index
    %8 = vector.load %arg4[%c0_6, %c0_7] : memref<128x64xf32, #tpu.memory_space<vmem>>, vector<128x64xf32>
    %cst_8 = arith.constant dense<0.000000e+00> : vector<8x64xf32>
    %9 = tpu.matmul %7, %8, %cst_8 {dimension_numbers = #tpu.dot_dimension_numbers<[1], [0], [0], [1], [0, 0, 1, 1], [], []>} : vector<8x128xf32>, vector<128x64xf32>, vector<8x64xf32> -> vector<8x64xf32>
    %c0_9 = arith.constant 0 : index
    %c0_10 = arith.constant 0 : index
    %10 = vector.load %arg5[%c0_9, %c0_10] : memref<1x64xf32, #tpu.memory_space<vmem>>, vector<1x64xf32>
    %11 = vector.broadcast %10 : vector<1x64xf32> to vector<8x64xf32>
    %12 = arith.addf %9, %11 : vector<8x64xf32>
    %13 = arith.negf %12 : vector<8x64xf32>
    %14 = math.exp %13 : vector<8x64xf32>
    %cst_11 = arith.constant 1.000000e+00 : f32
    %15 = vector.broadcast %cst_11 : f32 to vector<8x64xf32>
    %16 = arith.addf %15, %14 : vector<8x64xf32>
    %17 = arith.divf %15, %16 : vector<8x64xf32>
    %c0_12 = arith.constant 0 : index
    %c0_13 = arith.constant 0 : index
    %18 = vector.load %arg6[%c0_12, %c0_13] : memref<8x64xf32, #tpu.memory_space<vmem>>, vector<8x64xf32>
    tpu.vector_store %arg6[%c0_12, %c0_13], %17 {strides = array<i32>} : memref<8x64xf32, #tpu.memory_space<vmem>>, vector<8x64xf32>,
    return
  }
  func.func @transform_0(%arg0: i32) -> (i32, i32) {
    %c0_i32 = arith.constant 0 : i32
    %c0_i32_0 = arith.constant 0 : i32
    return %arg0, %c0_i32 : i32, i32
  }
  func.func @transform_1(%arg0: i32) -> (i32, i32) {
    %c0_i32 = arith.constant 0 : i32
    %c0_i32_0 = arith.constant 0 : i32
    %c0_i32_1 = arith.constant 0 : i32
    return %c0_i32, %c0_i32_0 : i32, i32
  }
  func.func @transform_2(%arg0: i32) -> (i32, i32) {
    %c0_i32 = arith.constant 0 : i32
    %c0_i32_0 = arith.constant 0 : i32
    %c0_i32_1 = arith.constant 0 : i32
    return %c0_i32, %c0_i32_0 : i32, i32
  }
  func.func @transform_3(%arg0: i32) -> (i32, i32) {
    %c0_i32 = arith.constant 0 : i32
    %c0_i32_0 = arith.constant 0 : i32
    %c0_i32_1 = arith.constant 0 : i32
    return %c0_i32, %c0_i32_0 : i32, i32
  }
  func.func @transform_4(%arg0: i32) -> (i32, i32) {
    %c0_i32 = arith.constant 0 : i32
    %c0_i32_0 = arith.constant 0 : i32
    %c0_i32_1 = arith.constant 0 : i32
    return %c0_i32, %c0_i32_0 : i32, i32
  }
  func.func @transform_5(%arg0: i32) -> (i32, i32) {
    %c0_i32 = arith.constant 0 : i32
    %c0_i32_0 = arith.constant 0 : i32
    return %arg0, %c0_i32 : i32, i32
  }
}

module attributes {stable_mosaic.version = 11 : i64} {
  func.func @_decoder_kernel(%arg0: i32, %arg1: memref<8x16xf32, #tpu.memory_space<vmem>>, %arg2: memref<16x128xf32, #tpu.memory_space<vmem>>, %arg3: memref<1x128xf32, #tpu.memory_space<vmem>>, %arg4: memref<128x64xf32, #tpu.memory_space<vmem>>, %arg5: memref<1x64xf32, #tpu.memory_space<vmem>>, %arg6: memref<8x64xf32, #tpu.memory_space<vmem>>) attributes {dimension_semantics = [#tpu.dimension_semantics<parallel>], iteration_bounds = array<i64: 1>, scalar_prefetch = 0 : i64, scratch_operands = 0 : i64, tpu.core_type = #tpu.core_type<tc>, window_params = [{transform_indices = @transform_0, window_bounds = array<i64: 8, 16>}, {pipeline_mode = #tpu.pipeline_mode<synchronous>, transform_indices = @transform_1, window_bounds = array<i64: 16, 128>}, {pipeline_mode = #tpu.pipeline_mode<synchronous>, transform_indices = @transform_2, window_bounds = array<i64: 1, 128>}, {pipeline_mode = #tpu.pipeline_mode<synchronous>, transform_indices = @transform_3, window_bounds = array<i64: 128, 64>}, {pipeline_mode = #tpu.pipeline_mode<synchronous>, transform_indices = @transform_4, window_bounds = array<i64: 1, 64>}, {transform_indices = @transform_5, window_bounds = array<i64: 8, 64>}]} {
    %c0 = arith.constant 0 : index
    %c0_0 = arith.constant 0 : index
    %0 = vector.load %arg1[%c0, %c0_0] : memref<8x16xf32, #tpu.memory_space<vmem>>, vector<8x16xf32>
    %c0_1 = arith.constant 0 : index
    %c0_2 = arith.constant 0 : index
    %1 = vector.load %arg2[%c0_1, %c0_2] : memref<16x128xf32, #tpu.memory_space<vmem>>, vector<16x128xf32>
    %cst = arith.constant dense<0.000000e+00> : vector<8x128xf32>
    %2 = tpu.matmul %0, %1, %cst {dimension_numbers = #tpu.dot_dimension_numbers<[1], [0], [0], [1], [0, 0, 1, 1], [], []>} : vector<8x16xf32>, vector<16x128xf32>, vector<8x128xf32> -> vector<8x128xf32>
    %c0_3 = arith.constant 0 : index
    %c0_4 = arith.constant 0 : index
    %3 = vector.load %arg3[%c0_3, %c0_4] : memref<1x128xf32, #tpu.memory_space<vmem>>, vector<1x128xf32>
    %4 = vector.broadcast %3 : vector<1x128xf32> to vector<8x128xf32>
    %5 = arith.addf %2, %4 : vector<8x128xf32>
    %cst_5 = arith.constant 0.000000e+00 : f32
    %6 = vector.broadcast %cst_5 : f32 to vector<8x128xf32>
    %7 = arith.maximumf %5, %6 : vector<8x128xf32>
    %c0_6 = arith.constant 0 : index
    %c0_7 = arith.constant 0 : index
    %8 = vector.load %arg4[%c0_6, %c0_7] : memref<128x64xf32, #tpu.memory_space<vmem>>, vector<128x64xf32>
    %cst_8 = arith.constant dense<0.000000e+00> : vector<8x64xf32>
    %9 = tpu.matmul %7, %8, %cst_8 {dimension_numbers = #tpu.dot_dimension_numbers<[1], [0], [0], [1], [0, 0, 1, 1], [], []>} : vector<8x128xf32>, vector<128x64xf32>, vector<8x64xf32> -> vector<8x64xf32>
    %c0_9 = arith.constant 0 : index
    %c0_10 = arith.constant 0 : index
    %10 = vector.load %arg5[%c0_9, %c0_10] : memref<1x64xf32, #tpu.memory_space<vmem>>, vector<1x64xf32>
    %11 = vector.broadcast %10 : vector<1x64xf32> to vector<8x64xf32>
    %12 = arith.addf %9, %11 : vector<8x64xf32>
    %13 = arith.negf %12 : vector<8x64xf32>
    %14 = math.exp %13 : vector<8x64xf32>
    %cst_11 = arith.constant 1.000000e+00 : f32
    %15 = vector.broadcast %cst_11 : f32 to vector<8x64xf32>
    %16 = arith.addf %15, %14 : vector<8x64xf32>
    %17 = arith.divf %15, %16 : vector<8x64xf32>
    %c0_12 = arith.constant 0 : index
    %c0_13 = arith.constant 0 : index
    %18 = vector.load %arg6[%c0_12, %c0_13] : memref<8x64xf32, #tpu.memory_space<vmem>>, vector<8x64xf32>
    tpu.vector_store %arg6[%c0_12, %c0_13], %17 {strides = array<i32>} : memref<8x64xf32, #tpu.memory_space<vmem>>, vector<8x64xf32>,
    return
  }
  func.func @transform_0(%arg0: i32) -> (i32, i32) {
    %c0_i32 = arith.constant 0 : i32
    %c0_i32_0 = arith.constant 0 : i32
    return %arg0, %c0_i32 : i32, i32
  }
  func.func @transform_1(%arg0: i32) -> (i32, i32) {
    %c0_i32 = arith.constant 0 : i32
    %c0_i32_0 = arith.constant 0 : i32
    %c0_i32_1 = arith.constant 0 : i32
    return %c0_i32, %c0_i32_0 : i32, i32
  }
  func.func @transform_2(%arg0: i32) -> (i32, i32) {
    %c0_i32 = arith.constant 0 : i32
    %c0_i32_0 = arith.constant 0 : i32
    %c0_i32_1 = arith.constant 0 : i32
    return %c0_i32, %c0_i32_0 : i32, i32
  }
  func.func @transform_3(%arg0: i32) -> (i32, i32) {
    %c0_i32 = arith.constant 0 : i32
    %c0_i32_0 = arith.constant 0 : i32
    %c0_i32_1 = arith.constant 0 : i32
    return %c0_i32, %c0_i32_0 : i32, i32
  }
  func.func @transform_4(%arg0: i32) -> (i32, i32) {
    %c0_i32 = arith.constant 0 : i32
    %c0_i32_0 = arith.constant 0 : i32
    %c0_i32_1 = arith.constant 0 : i32
    return %c0_i32, %c0_i32_0 : i32, i32
  }
  func.func @transform_5(%arg0: i32) -> (i32, i32) {
    %c0_i32 = arith.constant 0 : i32
    %c0_i32_0 = arith.constant 0 : i32
    return %arg0, %c0_i32 : i32, i32
  }
}

</mosaic_0001>

<bundles_post_ra>
// kernel: tpu_custom_call.1
= control target key start
LH: loop header
LB: loop body
LE: loop exit
PB: predicated region body
PF: predicated region fallthrough
CT: control target
= control target key end

     0   :  { %v316_v1 = vmov 0.0   ;;  %vm317_vm0 = vmmov 0   ;;  %vm31_vm1 = vcmask 130048   ;;  %s417_s0 = inlined_call_operand.vmem [shape: f32[8,16], index: 0, kind: input, shape index: {}]   ;;  %s418_s1 = inlined_call_operand.vmem [shape: f32[16,128], index: 1, kind: input, shape index: {}]   ;;  %s419_s2 = inlined_call_operand.vmem [shape: f32[1,128], index: 2, kind: input, shape index: {}]   ;;  %s420_s3 = inlined_call_operand.vmem [shape: f32[128,64], index: 3, kind: input, shape index: {}]   ;;  %s421_s4 = inlined_call_operand.vmem [shape: f32[1,64], index: 4, kind: input, shape index: {}]   ;;  %s422_s5 = inlined_call_operand.hbm [shape: f32[8,64], index: 5, kind: output, shape index: {}]  }
   0x1   :  { %v23_v0 = vld [vmem:[%s418_s1 + $0x8] sm:$0xff]  ;;  %245 = vmatprep.subr.mxu0 %v316_v1  ;;  %v22_v2 = vld [vmem:[%s418_s1] sm:$0xff]  ;;  %249 = vmatprep.mubr.msk.f32.mxu0 %vm317_vm0, %v316_v1  ;;  %v121_v3 = vld [vmem:[%s420_s3 + $0x78] sm:$0xff] }
   0x2   :  { %246 = vmatpush3.msra.mxu0 %v23_v0  ;;  %v21_v4 = vld [vmem:[%s417_s0] sm:$0xff]  ;;  %252 = vmatprep.subr.mxu1 %v316_v1  ;;  %v120_v5 = vld [vmem:[%s420_s3 + $0x70] sm:$0xff]  ;;  %v119_v6 = vld [vmem:[%s420_s3 + $0x68] sm:$0xff] }
   0x3   :  { %247 = vmatprep.subr.mxu0 %v316_v1  ;;  %253 = vmatpush3.msra.mxu1 %v121_v3 }
   0x4   :  { %248 = vmatpush3.msra.mxu0 %v22_v2  ;;  %254 = vmatprep.subr.mxu1 %v316_v1 }
   0x5   :  { %250 = vmatmul.mubr.msk.f32.vlgmr.msra.gmra.mxu0 %vm31_vm1, %v21_v4  ;;  %255 = vmatpush3.msra.mxu1 %v120_v5 }
   0x6   :  { %10 = vsyncpa [#allocation3], 0  ;;  %256 = vmatprep.subr.mxu1 %v316_v1  ;;  %v118_v7 = vld [vmem:[%s420_s3 + $0x60] sm:$0xff]  ;;  %284 = vmatprep.mubr.msk.f32.mxu1 %vm317_vm0, %v316_v1  ;;  %v117_v8 = vld [vmem:[%s420_s3 + $0x58] sm:$0xff]  ;;  %vm205_vm2 = vcmask 523264  }
   0x7   :  { %257 = vmatpush3.msra.mxu1 %v119_v6  ;;  %v116_v9 = vld [vmem:[%s420_s3 + $0x50] sm:$0xff]  ;;  %v115_v10 = vld [vmem:[%s420_s3 + $0x48] sm:$0xff]  ;;  %v114_v11 = vld [vmem:[%s420_s3 + $0x40] sm:$0xff] }
   0x8   :  { %258 = vmatprep.subr.mxu1 %v316_v1  ;;  %v113_v12 = vld [vmem:[%s420_s3 + $0x38] sm:$0xff]  ;;  %v112_v13 = vld [vmem:[%s420_s3 + $0x30] sm:$0xff]  ;;  %v111_v14 = vld [vmem:[%s420_s3 + $0x28] sm:$0xff] }
   0x9   :  { %259 = vmatpush3.msra.mxu1 %v118_v7  ;;  %v110_v15 = vld [vmem:[%s420_s3 + $0x20] sm:$0xff]  ;;  %v109_v16 = vld [vmem:[%s420_s3 + $0x18] sm:$0xff]  ;;  %v108_v17 = vld [vmem:[%s420_s3 + $0x10] sm:$0xff] }
   0xa   :  { %260 = vmatprep.subr.mxu1 %v316_v1  ;;  %v107_v18 = vld [vmem:[%s420_s3 + $0x8] sm:$0xff]  ;;  %v106_v19 = vld [vmem:[%s420_s3] sm:$0xff]  ;;  %s318_s3 = smov [#allocation2]  }
   0xb   :  { %261 = vmatpush3.msra.mxu1 %v117_v8  ;;  %v221_v20 = vld [vmem:[%s419_s2] ss:$0 sm:$0xff]  ;;  %s213_s6 = sshll.u32 %s318_s3, 4  ;;  %s214_s6 = int_to_ptr.vmem [resolvable:$true] %s213_s6 }
   0xc   :  { %262 = vmatprep.subr.mxu1 %v316_v1  ;;  %v223_v25 = vld [vmem:[%s421_s4] ss:$0 sm:$0xff]  ;;  %s294_s2 = scalar_lea.vmem %s214_s6, 128  ;;  %p299_p1 = scmp.lt.s32.totalorder %s214_s6, %s214_s6 }
   0xd   :  { %263 = vmatpush3.msra.mxu1 %v116_v9  ;;  %p295_p0 = scmp.ne.s32.totalorder %s214_s6, %s294_s2  ;;  %p300_p2 = scmp.lt.s32.totalorder %s294_s2, %s294_s2 }
   0xe   :  { %264 = vmatprep.subr.mxu1 %v316_v1 }
   0xf   :  { %265 = vmatpush3.msra.mxu1 %v115_v10  ;;  %p301_p3 = por %p300_p2, %p299_p1 }
  0x10   :  { %266 = vmatprep.subr.mxu1 %v316_v1 }
  0x11   :  { %267 = vmatpush3.msra.mxu1 %v114_v11  ;;  %p302_p4 = pnand %p301_p3, %p295_p0 }
  0x12   :  { %268 = vmatprep.subr.mxu1 %v316_v1 }
  0x13   :  { %269 = vmatpush3.msra.mxu1 %v113_v12 }
  0x14   :  { %270 = vmatprep.subr.mxu1 %v316_v1 }
  0x15   :  { %271 = vmatpush3.msra.mxu1 %v112_v13 }
  0x16   :  { %272 = vmatprep.subr.mxu1 %v316_v1 }
  0x17   :  { %273 = vmatpush3.msra.mxu1 %v111_v14 }
  0x18   :  { %274 = vmatprep.subr.mxu1 %v316_v1 }
  0x19   :  { %275 = vmatpush3.msra.mxu1 %v110_v15 }
  0x1a   :  { %276 = vmatprep.subr.mxu1 %v316_v1 }
  0x1b   :  { %277 = vmatpush3.msra.mxu1 %v109_v16 }
  0x1c   :  { %278 = vmatprep.subr.mxu1 %v316_v1 }
  0x1d   :  { %279 = vmatpush3.msra.mxu1 %v108_v17 }
  0x1e   :  { %280 = vmatprep.subr.mxu1 %v316_v1 }
  0x1f   :  { %281 = vmatpush3.msra.mxu1 %v107_v18 }
  0x20   :  { %282 = vmatprep.subr.mxu1 %v316_v1 }
  0x21   :  { %283 = vmatpush3.msra.mxu1 %v106_v19 }
  0xc5   :  { %v101_v21 = vpop.f32.mrf.mxu0 }
  0xc6   :  { %v102_v22 = vadd.f32 %v221_v20, %v101_v21 }
  0xc7   :  { %v251_v23 = vpop.f32.mrf.mxu0 }
  0xc8   :  { %v105_v24 = vmax.f32 %v102_v22, 0.0 }
  0xca   :  { %285 = vmatmul.mubr.f32.vlgmr.msra.gmra.mxu1 %v105_v24 }
 0x18a   :  { %v195_v26 = vpop.f32.mrf.mxu1 }
 0x18b   :  { %v196_v27 = vadd.f32 %v223_v25, %v195_v26 }
 0x18c   :  { %v286_v28 = vpop.f32.mrf.mxu1 }
 0x18d   :  { %v224_v29 = vmul.f32 -1.442695, %v196_v27 }
 0x18f   :  { %290 = vpow2.f32 %v224_v29 }
 0x19c   :  { %v291_v30 = vpop.eup %290 }
 0x19d   :  { %v202_v31 = vadd.f32 1.0, %v291_v30 }
 0x19f   :  { %292 = vrcp.f32 %v202_v31 }
 0x1ac   :  { %v293_v32 = vpop.eup %292 }
 0x1ad   :  { %206 = vst.msk [vmem:[#allocation2] sm:$0xff] %vm205_vm2, %v293_v32 }
 0x1ae   :  { %305 = shalt.err (!%p302_p4)
}
 0x1af   :  { %216 = dma.vmem_to_hbm [thread:$0]  %s214_s6, 128, %s422_s5, [#allocation3]  }
 0x1b0   :  { %314 = dma.done.wait [#allocation3], 128  }
 0x1b1   :  { %315 = vsyncadd [#allocation3], 4294967168 }
 0x1b2   :  { %220 = vsyncpa [#allocation3], 1 }

// kernel: tpu_custom_call.1
= control target key start
LH: loop header
LB: loop body
LE: loop exit
PB: predicated region body
PF: predicated region fallthrough
CT: control target
= control target key end

     0   :  { %v316_v1 = vmov 0.0   ;;  %vm317_vm0 = vmmov 0   ;;  %vm31_vm1 = vcmask 130048   ;;  %s417_s0 = inlined_call_operand.vmem [shape: f32[8,16], index: 0, kind: input, shape index: {}]   ;;  %s418_s1 = inlined_call_operand.vmem [shape: f32[16,128], index: 1, kind: input, shape index: {}]   ;;  %s419_s2 = inlined_call_operand.vmem [shape: f32[1,128], index: 2, kind: input, shape index: {}]   ;;  %s420_s3 = inlined_call_operand.vmem [shape: f32[128,64], index: 3, kind: input, shape index: {}]   ;;  %s421_s4 = inlined_call_operand.vmem [shape: f32[1,64], index: 4, kind: input, shape index: {}]   ;;  %s422_s5 = inlined_call_operand.hbm [shape: f32[8,64], index: 5, kind: output, shape index: {}]  }
   0x1   :  { %v23_v0 = vld [vmem:[%s418_s1 + $0x8] sm:$0xff]  ;;  %245 = vmatprep.subr.mxu0 %v316_v1  ;;  %v22_v2 = vld [vmem:[%s418_s1] sm:$0xff]  ;;  %249 = vmatprep.mubr.msk.f32.mxu0 %vm317_vm0, %v316_v1  ;;  %v121_v3 = vld [vmem:[%s420_s3 + $0x78] sm:$0xff] }
   0x2   :  { %246 = vmatpush3.msra.mxu0 %v23_v0  ;;  %v21_v4 = vld [vmem:[%s417_s0] sm:$0xff]  ;;  %252 = vmatprep.subr.mxu1 %v316_v1  ;;  %v120_v5 = vld [vmem:[%s420_s3 + $0x70] sm:$0xff]  ;;  %v119_v6 = vld [vmem:[%s420_s3 + $0x68] sm:$0xff] }
   0x3   :  { %247 = vmatprep.subr.mxu0 %v316_v1  ;;  %253 = vmatpush3.msra.mxu1 %v121_v3 }
   0x4   :  { %248 = vmatpush3.msra.mxu0 %v22_v2  ;;  %254 = vmatprep.subr.mxu1 %v316_v1 }
   0x5   :  { %250 = vmatmul.mubr.msk.f32.vlgmr.msra.gmra.mxu0 %vm31_vm1, %v21_v4  ;;  %255 = vmatpush3.msra.mxu1 %v120_v5 }
   0x6   :  { %10 = vsyncpa [#allocation3], 0  ;;  %256 = vmatprep.subr.mxu1 %v316_v1  ;;  %v118_v7 = vld [vmem:[%s420_s3 + $0x60] sm:$0xff]  ;;  %284 = vmatprep.mubr.msk.f32.mxu1 %vm317_vm0, %v316_v1  ;;  %v117_v8 = vld [vmem:[%s420_s3 + $0x58] sm:$0xff]  ;;  %vm205_vm2 = vcmask 523264  }
   0x7   :  { %257 = vmatpush3.msra.mxu1 %v119_v6  ;;  %v116_v9 = vld [vmem:[%s420_s3 + $0x50] sm:$0xff]  ;;  %v115_v10 = vld [vmem:[%s420_s3 + $0x48] sm:$0xff]  ;;  %v114_v11 = vld [vmem:[%s420_s3 + $0x40] sm:$0xff] }
   0x8   :  { %258 = vmatprep.subr.mxu1 %v316_v1  ;;  %v113_v12 = vld [vmem:[%s420_s3 + $0x38] sm:$0xff]  ;;  %v112_v13 = vld [vmem:[%s420_s3 + $0x30] sm:$0xff]  ;;  %v111_v14 = vld [vmem:[%s420_s3 + $0x28] sm:$0xff] }
   0x9   :  { %259 = vmatpush3.msra.mxu1 %v118_v7  ;;  %v110_v15 = vld [vmem:[%s420_s3 + $0x20] sm:$0xff]  ;;  %v109_v16 = vld [vmem:[%s420_s3 + $0x18] sm:$0xff]  ;;  %v108_v17 = vld [vmem:[%s420_s3 + $0x10] sm:$0xff] }
   0xa   :  { %260 = vmatprep.subr.mxu1 %v316_v1  ;;  %v107_v18 = vld [vmem:[%s420_s3 + $0x8] sm:$0xff]  ;;  %v106_v19 = vld [vmem:[%s420_s3] sm:$0xff]  ;;  %s318_s3 = smov [#allocation2]  }
   0xb   :  { %261 = vmatpush3.msra.mxu1 %v117_v8  ;;  %v221_v20 = vld [vmem:[%s419_s2] ss:$0 sm:$0xff]  ;;  %s213_s6 = sshll.u32 %s318_s3, 4  ;;  %s214_s6 = int_to_ptr.vmem [resolvable:$true] %s213_s6 }
   0xc   :  { %262 = vmatprep.subr.mxu1 %v316_v1  ;;  %v223_v25 = vld [vmem:[%s421_s4] ss:$0 sm:$0xff]  ;;  %s294_s2 = scalar_lea.vmem %s214_s6, 128  ;;  %p299_p1 = scmp.lt.s32.totalorder %s214_s6, %s214_s6 }
   0xd   :  { %263 = vmatpush3.msra.mxu1 %v116_v9  ;;  %p295_p0 = scmp.ne.s32.totalorder %s214_s6, %s294_s2  ;;  %p300_p2 = scmp.lt.s32.totalorder %s294_s2, %s294_s2 }
   0xe   :  { %264 = vmatprep.subr.mxu1 %v316_v1 }
   0xf   :  { %265 = vmatpush3.msra.mxu1 %v115_v10  ;;  %p301_p3 = por %p300_p2, %p299_p1 }
  0x10   :  { %266 = vmatprep.subr.mxu1 %v316_v1 }
  0x11   :  { %267 = vmatpush3.msra.mxu1 %v114_v11  ;;  %p302_p4 = pnand %p301_p3, %p295_p0 }
  0x12   :  { %268 = vmatprep.subr.mxu1 %v316_v1 }
  0x13   :  { %269 = vmatpush3.msra.mxu1 %v113_v12 }
  0x14   :  { %270 = vmatprep.subr.mxu1 %v316_v1 }
  0x15   :  { %271 = vmatpush3.msra.mxu1 %v112_v13 }
  0x16   :  { %272 = vmatprep.subr.mxu1 %v316_v1 }
  0x17   :  { %273 = vmatpush3.msra.mxu1 %v111_v14 }
  0x18   :  { %274 = vmatprep.subr.mxu1 %v316_v1 }
  0x19   :  { %275 = vmatpush3.msra.mxu1 %v110_v15 }
  0x1a   :  { %276 = vmatprep.subr.mxu1 %v316_v1 }
  0x1b   :  { %277 = vmatpush3.msra.mxu1 %v109_v16 }
  0x1c   :  { %278 = vmatprep.subr.mxu1 %v316_v1 }
  0x1d   :  { %279 = vmatpush3.msra.mxu1 %v108_v17 }
  0x1e   :  { %280 = vmatprep.subr.mxu1 %v316_v1 }
  0x1f   :  { %281 = vmatpush3.msra.mxu1 %v107_v18 }
  0x20   :  { %282 = vmatprep.subr.mxu1 %v316_v1 }
  0x21   :  { %283 = vmatpush3.msra.mxu1 %v106_v19 }
  0xc5   :  { %v101_v21 = vpop.f32.mrf.mxu0 }
  0xc6   :  { %v102_v22 = vadd.f32 %v221_v20, %v101_v21 }
  0xc7   :  { %v251_v23 = vpop.f32.mrf.mxu0 }
  0xc8   :  { %v105_v24 = vmax.f32 %v102_v22, 0.0 }
  0xca   :  { %285 = vmatmul.mubr.f32.vlgmr.msra.gmra.mxu1 %v105_v24 }
 0x18a   :  { %v195_v26 = vpop.f32.mrf.mxu1 }
 0x18b   :  { %v196_v27 = vadd.f32 %v223_v25, %v195_v26 }
 0x18c   :  { %v286_v28 = vpop.f32.mrf.mxu1 }
 0x18d   :  { %v224_v29 = vmul.f32 -1.442695, %v196_v27 }
 0x18f   :  { %290 = vpow2.f32 %v224_v29 }
 0x19c   :  { %v291_v30 = vpop.eup %290 }
 0x19d   :  { %v202_v31 = vadd.f32 1.0, %v291_v30 }
 0x19f   :  { %292 = vrcp.f32 %v202_v31 }
 0x1ac   :  { %v293_v32 = vpop.eup %292 }
 0x1ad   :  { %206 = vst.msk [vmem:[#allocation2] sm:$0xff] %vm205_vm2, %v293_v32 }
 0x1ae   :  { %305 = shalt.err (!%p302_p4)
}
 0x1af   :  { %216 = dma.vmem_to_hbm [thread:$0]  %s214_s6, 128, %s422_s5, [#allocation3]  }
 0x1b0   :  { %314 = dma.done.wait [#allocation3], 128  }
 0x1b1   :  { %315 = vsyncadd [#allocation3], 4294967168 }
 0x1b2   :  { %220 = vsyncpa [#allocation3], 1 }

</bundles_post_ra>
